<compile_context>
chip_gen: v6e
topology: v6e:2x2x1
jax: 0.10.0
libtpu: 0.0.40
codegen_flags: <defaults>
</compile_context>

<pallas_src>
import functools

import jax
import jax.numpy as jnp
from jax.experimental import pallas as pl
from jax.experimental.pallas import tpu as pltpu

_LANE = 128
_SUBLANE = 8


def _round_up(n, m):
    return ((n + m - 1) // m) * m


def anet_kernel(x_ref, w1_ref, b1_ref, w2_ref, b2_ref, o_ref):
    # fc1: bf16 MXU matmul, f32 accumulate; bias + ReLU in f32 on the VPU.
    h = jnp.dot(x_ref[...], w1_ref[...], preferred_element_type=jnp.float32)
    h = jnp.maximum(h + b1_ref[...], 0.0)
    # out: bf16 MXU matmul, f32 accumulate; bias + tanh in f32 (tanh -> EUP).
    y = jnp.dot(h.astype(jnp.bfloat16), w2_ref[...],
                preferred_element_type=jnp.float32)
    o_ref[...] = jnp.tanh(y + b2_ref[...]).astype(o_ref.dtype)


@functools.partial(jax.jit, static_argnames=("block_b",))
def anet_forward(x, w1, b1, w2, b2, *, block_b=512):
    """y = tanh(relu(x @ w1 + b1) @ w2 + b2); weights stored as (in, out)."""
    B, s_dim = x.shape
    hidden = w1.shape[1]
    a_dim = w2.shape[1]

    # Padded problem sizes: lane-dense output, full MXU tiles.
    s_pad = _round_up(s_dim, _SUBLANE)
    h_pad = _round_up(hidden, _LANE)
    a_pad = _round_up(a_dim, _LANE)
    tb = min(_round_up(B, _SUBLANE), block_b)     # batch tile
    b_pad = _round_up(B, tb)

    f32 = jnp.float32
    bf16 = jnp.bfloat16

    # Zero-pad at the boundary; zeros are exact no-ops through linear->relu->linear.
    xp = jnp.zeros((b_pad, s_pad), bf16).at[:B, :s_dim].set(x.astype(bf16))
    w1p = jnp.zeros((s_pad, h_pad), bf16).at[:s_dim, :hidden].set(w1.astype(bf16))
    b1p = jnp.zeros((1, h_pad), f32).at[:, :hidden].set(b1.astype(f32))
    w2p = jnp.zeros((h_pad, a_pad), bf16).at[:hidden, :a_dim].set(w2.astype(bf16))
    b2p = jnp.zeros((1, a_pad), f32).at[:, :a_dim].set(b2.astype(f32))

    grid = (b_pad // tb,)

    flops = 2 * b_pad * (s_pad * h_pad + h_pad * a_pad)
    bytes_accessed = ((xp.size + w1p.size + w2p.size) * 2
                      + (b1p.size + b2p.size) * 4
                      + b_pad * a_pad * 4)

    out_padded = pl.pallas_call(
        anet_kernel,
        out_shape=jax.ShapeDtypeStruct((b_pad, a_pad), f32),
        grid=grid,
        in_specs=[
            pl.BlockSpec((tb, s_pad), lambda i: (i, 0)),     # x tile per grid step
            pl.BlockSpec((s_pad, h_pad), lambda i: (0, 0)),  # weights stay resident
            pl.BlockSpec((1, h_pad), lambda i: (0, 0)),
            pl.BlockSpec((h_pad, a_pad), lambda i: (0, 0)),
            pl.BlockSpec((1, a_pad), lambda i: (0, 0)),
        ],
        out_specs=pl.BlockSpec((tb, a_pad), lambda i: (i, 0)),
        compiler_params=pltpu.CompilerParams(
            dimension_semantics=("parallel",),   # batch axis shards across TCs
            vmem_limit_bytes=32 * 1024 * 1024,   # safe on v5e / v6e / v7x
        ),
        cost_estimate=pl.CostEstimate(
            flops=flops,
            transcendentals=b_pad * a_pad,
            bytes_accessed=bytes_accessed,
        ),
    )(xp, w1p, b1p, w2p, b2p)

    return out_padded[:B, :a_dim]


def init_params(key, s_dim, a_dim, hidden=30):
    k1, k2, k3, k4 = jax.random.split(key, 4)
    # Matches ANet.__init__: weights ~ N(0, 0.1); biases keep PyTorch Linear's
    # default uniform(-1/sqrt(fan_in), +1/sqrt(fan_in)) init.
    w1 = 0.1 * jax.random.normal(k1, (s_dim, hidden), dtype=jnp.float32)
    b1 = jax.random.uniform(
        k2, (1, hidden), minval=-1.0 / jnp.sqrt(s_dim), maxval=1.0 / jnp.sqrt(s_dim)
    ).astype(jnp.float32)
    w2 = 0.1 * jax.random.normal(k3, (hidden, a_dim), dtype=jnp.float32)
    b2 = jax.random.uniform(
        k4, (1, a_dim), minval=-1.0 / jnp.sqrt(hidden), maxval=1.0 / jnp.sqrt(hidden)
    ).astype(jnp.float32)
    return w1, b1, w2, b2


if __name__ == "__main__":
    key = jax.random.PRNGKey(0)
    kx, kp = jax.random.split(key)

    B, s_dim, a_dim = 8, 16, 4
    x = jax.random.normal(kx, (B, s_dim), dtype=jnp.float32)
    w1, b1, w2, b2 = init_params(kp, s_dim, a_dim)

    actions_value = anet_forward(x, w1, b1, w2, b2)
    jax.block_until_ready(actions_value)
    assert actions_value.shape == (B, a_dim)

    # Reference 1: same bf16-operand / f32-accumulate path in plain JAX.
    xb, w1b, w2b = (t.astype(jnp.bfloat16) for t in (x, w1, w2))
    h_ref = jnp.maximum(
        jnp.dot(xb, w1b, preferred_element_type=jnp.float32) + b1, 0.0)
    ref_bf16 = jnp.tanh(
        jnp.dot(h_ref.astype(jnp.bfloat16), w2b,
                preferred_element_type=jnp.float32) + b2)
    assert jnp.allclose(actions_value, ref_bf16, atol=1e-3), "mismatch vs bf16 ref"

    # Reference 2: full-f32 PyTorch-equivalent forward (loose tol for bf16 operands).
    ref_f32 = jnp.tanh(jnp.maximum(x @ w1 + b1, 0.0) @ w2 + b2)
    assert jnp.allclose(actions_value, ref_f32, atol=2e-2), "mismatch vs f32 ref"

    print("KERNEL_OK")
</pallas_src>

<mosaic_0001>
module attributes {stable_mosaic.version = 11 : i64} {
  func.func @anet_kernel(%arg0: i32, %arg1: memref<8x16xbf16, #tpu.memory_space<vmem>>, %arg2: memref<16x128xbf16, #tpu.memory_space<vmem>>, %arg3: memref<1x128xf32, #tpu.memory_space<vmem>>, %arg4: memref<128x128xbf16, #tpu.memory_space<vmem>>, %arg5: memref<1x128xf32, #tpu.memory_space<vmem>>, %arg6: memref<8x128xf32, #tpu.memory_space<vmem>>) attributes {dimension_semantics = [#tpu.dimension_semantics<parallel>], iteration_bounds = array<i64: 1>, scalar_prefetch = 0 : i64, scratch_operands = 0 : i64, tpu.core_type = #tpu.core_type<tc>, window_params = [{transform_indices = @transform_0, window_bounds = array<i64: 8, 16>}, {pipeline_mode = #tpu.pipeline_mode<synchronous>, transform_indices = @transform_1, window_bounds = array<i64: 16, 128>}, {pipeline_mode = #tpu.pipeline_mode<synchronous>, transform_indices = @transform_2, window_bounds = array<i64: 1, 128>}, {pipeline_mode = #tpu.pipeline_mode<synchronous>, transform_indices = @transform_3, window_bounds = array<i64: 128, 128>}, {pipeline_mode = #tpu.pipeline_mode<synchronous>, transform_indices = @transform_4, window_bounds = array<i64: 1, 128>}, {transform_indices = @transform_5, window_bounds = array<i64: 8, 128>}]} {
    %c0 = arith.constant 0 : index
    %c0_0 = arith.constant 0 : index
    %0 = vector.load %arg1[%c0, %c0_0] : memref<8x16xbf16, #tpu.memory_space<vmem>>, vector<8x16xbf16>
    %c0_1 = arith.constant 0 : index
    %c0_2 = arith.constant 0 : index
    %1 = vector.load %arg2[%c0_1, %c0_2] : memref<16x128xbf16, #tpu.memory_space<vmem>>, vector<16x128xbf16>
    %cst = arith.constant dense<0.000000e+00> : vector<8x128xf32>
    %2 = tpu.matmul %0, %1, %cst {dimension_numbers = #tpu.dot_dimension_numbers<[1], [0], [0], [1], [0, 0, 1, 1], [], []>} : vector<8x16xbf16>, vector<16x128xbf16>, vector<8x128xf32> -> vector<8x128xf32>
    %c0_3 = arith.constant 0 : index
    %c0_4 = arith.constant 0 : index
    %3 = vector.load %arg3[%c0_3, %c0_4] : memref<1x128xf32, #tpu.memory_space<vmem>>, vector<1x128xf32>
    %4 = vector.broadcast %3 : vector<1x128xf32> to vector<8x128xf32>
    %5 = arith.addf %2, %4 : vector<8x128xf32>
    %cst_5 = arith.constant 0.000000e+00 : f32
    %6 = vector.broadcast %cst_5 : f32 to vector<8x128xf32>
    %7 = arith.maximumf %5, %6 : vector<8x128xf32>
    %8 = arith.truncf %7 : vector<8x128xf32> to vector<8x128xbf16>
    %c0_6 = arith.constant 0 : index
    %c0_7 = arith.constant 0 : index
    %9 = vector.load %arg4[%c0_6, %c0_7] : memref<128x128xbf16, #tpu.memory_space<vmem>>, vector<128x128xbf16>
    %cst_8 = arith.constant dense<0.000000e+00> : vector<8x128xf32>
    %10 = tpu.matmul %8, %9, %cst_8 {dimension_numbers = #tpu.dot_dimension_numbers<[1], [0], [0], [1], [0, 0, 1, 1], [], []>} : vector<8x128xbf16>, vector<128x128xbf16>, vector<8x128xf32> -> vector<8x128xf32>
    %c0_9 = arith.constant 0 : index
    %c0_10 = arith.constant 0 : index
    %11 = vector.load %arg5[%c0_9, %c0_10] : memref<1x128xf32, #tpu.memory_space<vmem>>, vector<1x128xf32>
    %12 = vector.broadcast %11 : vector<1x128xf32> to vector<8x128xf32>
    %13 = arith.addf %10, %12 : vector<8x128xf32>
    %14 = math.tanh %13 : vector<8x128xf32>
    %c0_11 = arith.constant 0 : index
    %c0_12 = arith.constant 0 : index
    %15 = vector.load %arg6[%c0_11, %c0_12] : memref<8x128xf32, #tpu.memory_space<vmem>>, vector<8x128xf32>
    tpu.vector_store %arg6[%c0_11, %c0_12], %14 {strides = array<i32>} : memref<8x128xf32, #tpu.memory_space<vmem>>, vector<8x128xf32>,
    return
  }
  func.func @transform_0(%arg0: i32) -> (i32, i32) {
    %c0_i32 = arith.constant 0 : i32
    %c0_i32_0 = arith.constant 0 : i32
    return %arg0, %c0_i32 : i32, i32
  }
  func.func @transform_1(%arg0: i32) -> (i32, i32) {
    %c0_i32 = arith.constant 0 : i32
    %c0_i32_0 = arith.constant 0 : i32
    %c0_i32_1 = arith.constant 0 : i32
    return %c0_i32, %c0_i32_0 : i32, i32
  }
  func.func @transform_2(%arg0: i32) -> (i32, i32) {
    %c0_i32 = arith.constant 0 : i32
    %c0_i32_0 = arith.constant 0 : i32
    %c0_i32_1 = arith.constant 0 : i32
    return %c0_i32, %c0_i32_0 : i32, i32
  }
  func.func @transform_3(%arg0: i32) -> (i32, i32) {
    %c0_i32 = arith.constant 0 : i32
    %c0_i32_0 = arith.constant 0 : i32
    %c0_i32_1 = arith.constant 0 : i32
    return %c0_i32, %c0_i32_0 : i32, i32
  }
  func.func @transform_4(%arg0: i32) -> (i32, i32) {
    %c0_i32 = arith.constant 0 : i32
    %c0_i32_0 = arith.constant 0 : i32
    %c0_i32_1 = arith.constant 0 : i32
    return %c0_i32, %c0_i32_0 : i32, i32
  }
  func.func @transform_5(%arg0: i32) -> (i32, i32) {
    %c0_i32 = arith.constant 0 : i32
    %c0_i32_0 = arith.constant 0 : i32
    return %arg0, %c0_i32 : i32, i32
  }
}

</mosaic_0001>

<bundles_post_ra>
// kernel: anet_forward.1
= control target key start
LH: loop header
LB: loop body
LE: loop exit
PB: predicated region body
PF: predicated region fallthrough
CT: control target
= control target key end

     0   :  { %v262_v0 = vmov 0.0   ;;  %vm263_vm0 = vmmov 0   ;;  %vm37_vm1 = vcmask 130048   ;;  %s333_s1 = inlined_call_operand.vmem [shape: bf16[16,128], index: 1, kind: input, shape index: {}]   ;;  %s334_s0 = inlined_call_operand.vmem [shape: bf16[8,16], index: 0, kind: input, shape index: {}]   ;;  %s335_s3 = inlined_call_operand.vmem [shape: bf16[128,128], index: 3, kind: input, shape index: {}]   ;;  %s336_s2 = inlined_call_operand.vmem [shape: f32[1,128], index: 2, kind: input, shape index: {}]   ;;  %s337_s4 = inlined_call_operand.vmem [shape: f32[1,128], index: 4, kind: input, shape index: {}]   ;;  %s338_s5 = inlined_call_operand.vmem [shape: f32[8,128], index: 5, kind: output, shape index: {}]  }
   0x1   :  { %223 = vmatprep.subr.bf16.mxu0 %v262_v0  ;;  %v251_v1 = vld [vmem:[%s333_s1] sm:$0xff]   ;;  %225 = vmatprep.mubr.msk.bf16.mxu0 %vm263_vm0, %v262_v0  ;;  %v252_v3 = vld [vmem:[%s335_s3 + $0x38] sm:$0xff]   ;;  %v253_v4 = vld [vmem:[%s335_s3 + $0x30] sm:$0xff]  }
   0x2   :  { %v21_v2 = vld [vmem:[%s334_s0] sm:$0xf]  ;;  %229 = vmatprep.subr.bf16.mxu1 %v262_v0  ;;  %245 = vmatprep.mubr.msk.bf16.mxu1 %vm263_vm0, %v262_v0  ;;  %v254_v5 = vld [vmem:[%s335_s3 + $0x28] sm:$0xff]   ;;  %v256_v7 = vld [vmem:[%s335_s3 + $0x18] sm:$0xff]  }
   0x3   :  { %224 = vmatpush3.bf16.msra.mxu0 %v251_v1  ;;  %230 = vmatpush3.bf16.msra.mxu1 %v252_v3  ;;  %v255_v6 = vld [vmem:[%s335_s3 + $0x20] sm:$0xff]   ;;  %v257_v8 = vld [vmem:[%s335_s3 + $0x10] sm:$0xff]   ;;  %v258_v9 = vld [vmem:[%s335_s3 + $0x8] sm:$0xff]  }
   0x4   :  { %231 = vmatprep.subr.bf16.mxu1 %v262_v0  ;;  %v259_v10 = vld [vmem:[%s335_s3] sm:$0xff]  }
   0x5   :  { %v200_v11 = vld [vmem:[%s336_s2] ss:$0 sm:$0xff] }
   0x6   :  { %226 = vmatmul.mubr.msk.bf16.vlgmr.msra.gmra.mxu0 %vm37_vm1, %v21_v2  ;;  %v203_v19 = vld [vmem:[%s337_s4] ss:$0 sm:$0xff] }
   0x7   :  { %232 = vmatpush3.bf16.msra.mxu1 %v253_v4 }
   0x8   :  { %233 = vmatprep.subr.bf16.mxu1 %v262_v0 }
   0xb   :  { %234 = vmatpush3.bf16.msra.mxu1 %v254_v5 }
   0xc   :  { %235 = vmatprep.subr.bf16.mxu1 %v262_v0 }
   0xf   :  { %236 = vmatpush3.bf16.msra.mxu1 %v255_v6 }
  0x10   :  { %237 = vmatprep.subr.bf16.mxu1 %v262_v0 }
  0x13   :  { %238 = vmatpush3.bf16.msra.mxu1 %v256_v7 }
  0x14   :  { %239 = vmatprep.subr.bf16.mxu1 %v262_v0 }
  0x17   :  { %240 = vmatpush3.bf16.msra.mxu1 %v257_v8 }
  0x18   :  { %241 = vmatprep.subr.bf16.mxu1 %v262_v0 }
  0x1b   :  { %242 = vmatpush3.bf16.msra.mxu1 %v258_v9 }
  0x1c   :  { %243 = vmatprep.subr.bf16.mxu1 %v262_v0 }
  0x1f   :  { %244 = vmatpush3.bf16.msra.mxu1 %v259_v10 }
  0xc6   :  { %v75_v12 = vpop.f32.mrf.mxu0 }
  0xc7   :  { %v76_v13 = vadd.f32 %v200_v11, %v75_v12 }
  0xc8   :  { %v227_v14 = vpop.f32.mrf.mxu0 }
  0xc9   :  { %v81_v15 = vmax.f32 %v76_v13, 0.0 }
  0xca   :  { %v78_v16 = vpop.f32.mrf.mxu0 }
  0xcb   :  { %v82_v17 = vpack.c.bf16 %v81_v15, %v81_v15 }
  0xcc   :  { %v228_v18 = vpop.f32.mrf.mxu0 }
  0xcd   :  { %246 = vmatmul.mubr.bf16.vlgmr.msra.gmra.mxu1 %v82_v17 }
 0x18d   :  { %v188_v20 = vpop.f32.mrf.mxu1 }
 0x18e   :  { %v189_v21 = vadd.f32 %v203_v19, %v188_v20 }
 0x18f   :  { %v247_v22 = vpop.f32.mrf.mxu1 }
 0x190   :  { %260 = vtanh.f32 %v189_v21 }
 0x191   :  { %v191_v23 = vpop.f32.mrf.mxu1 }
 0x193   :  { %v248_v24 = vpop.f32.mrf.mxu1 }
 0x19d   :  { %v261_v25 = vpop.eup %260 }
 0x19e   :  { %195 = vst [vmem:[%s338_s5] sm:$0xff] %v261_v25 }

</bundles_post_ra>
